<compile_context>
chip_gen: v7x
topology: tpu7x:2x2x1
jax: 0.10.0
libtpu: 0.0.40
codegen_flags: <defaults>
</compile_context>

<pallas_src>
import functools

import jax
import jax.numpy as jnp
from jax import lax
from jax.experimental import pallas as pl
from jax.experimental.pallas import tpu as pltpu


def _round_up(x: int, m: int) -> int:
    return ((x + m - 1) // m) * m


def _just_last_node_loss_kernel(pred_ref, target_ref, out_ref, *, pos_w, rot_w):
    # pred_ref / target_ref: (7, TB) tiles, batch on the lane axis.
    i = pl.program_id(0)

    @pl.when(i == 0)
    def _init():
        out_ref[...] = jnp.zeros_like(out_ref)

    p = pred_ref[...].astype(jnp.float32)
    t = target_ref[...].astype(jnp.float32)
    diff = p - t
    sq = diff * diff

    # Reduce over the lane (batch) axis first: (7, TB) -> (7, 1).
    row_sums = jnp.sum(sq, axis=1, keepdims=True)

    # Per-row weights: rows 0..2 are position, rows 3..6 are rotation.
    row = lax.broadcasted_iota(jnp.int32, row_sums.shape, 0)
    w = jnp.where(row < 3, jnp.float32(pos_w), jnp.float32(rot_w))

    partial = jnp.sum(w * row_sums)
    out_ref[...] += jnp.reshape(partial, (1, 1))


def just_last_node_loss(pred, target, *, batch_size, alpha=20, graph_length=5,
                        lane_tile=1024):
    assert pred.shape == target.shape, "pred and target should have the same shape."
    assert pred.shape[1] == 7, "pred and target should have 7 columns."
    assert batch_size * graph_length == pred.shape[0], (
        "pred should have shape (batch_size * graph_length, 7)."
    )

    b = batch_size

    # Gather only the last node of every graph (native dtype, no upcast here),
    # and present it lane-dense as (7, B).
    lp = pred.reshape(b, graph_length, 7)[:, graph_length - 1, :].T
    lt = target.reshape(b, graph_length, 7)[:, graph_length - 1, :].T

    # Pad the batch/lane axis so every tile is a full (7, tb) block.  Zero
    # padding is exact for this reduction (diff == 0 on padded columns).
    b_pad = _round_up(max(b, 1), 128)
    tb = min(lane_tile, b_pad)
    b_pad = _round_up(b_pad, tb)
    if b_pad != b:
        pad = ((0, 0), (0, b_pad - b))
        lp = jnp.pad(lp, pad)
        lt = jnp.pad(lt, pad)

    num_tiles = b_pad // tb

    # Fused mean + alpha weights.
    pos_w = 1.0 / (3.0 * b)
    rot_w = float(alpha) / (4.0 * b)

    out = pl.pallas_call(
        functools.partial(_just_last_node_loss_kernel, pos_w=pos_w, rot_w=rot_w),
        out_shape=jax.ShapeDtypeStruct((1, 1), jnp.float32),
        grid=(num_tiles,),
        in_specs=[
            pl.BlockSpec((7, tb), lambda i: (0, i)),
            pl.BlockSpec((7, tb), lambda i: (0, i)),
        ],
        out_specs=pl.BlockSpec((1, 1), lambda i: (0, 0)),
        compiler_params=pltpu.CompilerParams(
            dimension_semantics=("arbitrary",)),
    )(lp, lt)
    return out[0, 0]


def _reference(pred, target, *, batch_size, alpha=20, graph_length=5):
    pred3 = pred.reshape(batch_size, graph_length, 7)
    target3 = target.reshape(batch_size, graph_length, 7)
    last_pred = pred3[:, -1, :]
    last_target = target3[:, -1, :]
    pos_loss = jnp.mean((last_pred[:, :3] - last_target[:, :3]) ** 2)
    rot_loss = jnp.mean((last_pred[:, 3:] - last_target[:, 3:]) ** 2)
    return pos_loss + rot_loss * alpha


if __name__ == "__main__":
    graph_length = 5
    alpha = 20
    key = jax.random.PRNGKey(0)

    # Case 1: small batch (single tile path).
    batch_size = 4
    k_pred, k_target, key = jax.random.split(key, 3)
    pred = jax.random.normal(k_pred, (batch_size * graph_length, 7), dtype=jnp.float32)
    target = jax.random.normal(k_target, (batch_size * graph_length, 7), dtype=jnp.float32)

    loss = just_last_node_loss(
        pred, target, batch_size=batch_size, alpha=alpha, graph_length=graph_length
    )
    loss = jax.block_until_ready(loss)
    ref = _reference(
        pred, target, batch_size=batch_size, alpha=alpha, graph_length=graph_length
    )
    assert jnp.allclose(loss, ref, rtol=1e-5, atol=1e-5), (loss, ref)

    # Case 2: exercise the multi-tile reduction + padding path.
    batch_size2 = 300
    k_pred2, k_target2, key = jax.random.split(key, 3)
    pred2 = jax.random.normal(k_pred2, (batch_size2 * graph_length, 7), dtype=jnp.float32)
    target2 = jax.random.normal(k_target2, (batch_size2 * graph_length, 7), dtype=jnp.float32)

    loss2 = just_last_node_loss(
        pred2, target2, batch_size=batch_size2, alpha=alpha,
        graph_length=graph_length, lane_tile=128,
    )
    loss2 = jax.block_until_ready(loss2)
    ref2 = _reference(
        pred2, target2, batch_size=batch_size2, alpha=alpha, graph_length=graph_length
    )
    assert jnp.allclose(loss2, ref2, rtol=1e-5, atol=1e-5), (loss2, ref2)

    print("KERNEL_OK")
</pallas_src>

<mosaic_0001>
module attributes {stable_mosaic.version = 11 : i64} {
  func.func @_just_last_node_loss_kernel(%arg0: i32, %arg1: memref<7x128xf32, #tpu.memory_space<vmem>>, %arg2: memref<7x128xf32, #tpu.memory_space<vmem>>, %arg3: memref<1x1xf32, #tpu.memory_space<vmem>>) attributes {dimension_semantics = [#tpu.dimension_semantics<arbitrary>], iteration_bounds = array<i64: 1>, scalar_prefetch = 0 : i64, scratch_operands = 0 : i64, tpu.core_type = #tpu.core_type<tc>, window_params = [{transform_indices = @transform_0, window_bounds = array<i64: 7, 128>}, {transform_indices = @transform_1, window_bounds = array<i64: 7, 128>}, {pipeline_mode = #tpu.pipeline_mode<synchronous>, transform_indices = @transform_2, window_bounds = array<i64: 1, 1>}]} {
    %c0_i32 = arith.constant 0 : i32
    %0 = arith.cmpi eq, %arg0, %c0_i32 : i32
    %1 = arith.extui %0 : i1 to i32
    %c0_i32_0 = arith.constant 0 : i32
    %2 = arith.cmpi ne, %1, %c0_i32_0 : i32
    scf.if %2 {
      %cst_11 = arith.constant 0.000000e+00 : f32
      %24 = vector.broadcast %cst_11 : f32 to vector<1x1xf32>
      %c0_12 = arith.constant 0 : index
      %c0_13 = arith.constant 0 : index
      %25 = vector.load %arg3[%c0_12, %c0_13] : memref<1x1xf32, #tpu.memory_space<vmem>>, vector<1x1xf32>
      tpu.vector_store %arg3[%c0_12, %c0_13], %24 {strides = array<i32>} : memref<1x1xf32, #tpu.memory_space<vmem>>, vector<1x1xf32>,
    } else {
    }
    %c0 = arith.constant 0 : index
    %c0_1 = arith.constant 0 : index
    %3 = vector.load %arg1[%c0, %c0_1] : memref<7x128xf32, #tpu.memory_space<vmem>>, vector<7x128xf32>
    %c0_2 = arith.constant 0 : index
    %c0_3 = arith.constant 0 : index
    %4 = vector.load %arg2[%c0_2, %c0_3] : memref<7x128xf32, #tpu.memory_space<vmem>>, vector<7x128xf32>
    %5 = arith.subf %3, %4 : vector<7x128xf32>
    %6 = arith.mulf %5, %5 : vector<7x128xf32>
    %cst = arith.constant dense<0.000000e+00> : vector<7xf32>
    %7 = vector.multi_reduction <add>, %6, %cst [1] : vector<7x128xf32> to vector<7xf32>
    %8 = vector.shape_cast %7 : vector<7xf32> to vector<7x1xf32>
    %9 = tpu.iota {dimensions = array<i32: 0>} : vector<7x1xi32>
    %c3_i32 = arith.constant 3 : i32
    %10 = vector.broadcast %c3_i32 : i32 to vector<7x1xi32>
    %11 = arith.cmpi slt, %9, %10 : vector<7x1xi32>
    %cst_4 = arith.constant 0.0833333358 : f32
    %cst_5 = arith.constant 1.250000e+00 : f32
    %12 = vector.broadcast %cst_4 : f32 to vector<7x1xf32>
    %13 = vector.broadcast %cst_5 : f32 to vector<7x1xf32>
    %14 = arith.select %11, %12, %13 : vector<7x1xi1>, vector<7x1xf32>
    %15 = arith.mulf %14, %8 : vector<7x1xf32>
    %16 = vector.shape_cast %15 : vector<7x1xf32> to vector<1x7x1xf32>
    %cst_6 = arith.constant dense<0.000000e+00> : vector<1xf32>
    %17 = vector.multi_reduction <add>, %16, %cst_6 [1, 2] : vector<1x7x1xf32> to vector<1xf32>
    %18 = vector.shape_cast %17 : vector<1xf32> to vector<1x1x1xf32>
    %19 = vector.extract %18[0, 0, 0] : f32 from vector<1x1x1xf32>
    %c0_7 = arith.constant 0 : index
    %c0_8 = arith.constant 0 : index
    %20 = vector.load %arg3[%c0_7, %c0_8] : memref<1x1xf32, #tpu.memory_space<vmem>>, vector<1x1xf32>
    %21 = vector.broadcast %19 : f32 to vector<1x1xf32>
    %22 = arith.addf %20, %21 : vector<1x1xf32>
    %c0_9 = arith.constant 0 : index
    %c0_10 = arith.constant 0 : index
    %23 = vector.load %arg3[%c0_9, %c0_10] : memref<1x1xf32, #tpu.memory_space<vmem>>, vector<1x1xf32>
    tpu.vector_store %arg3[%c0_9, %c0_10], %22 {strides = array<i32>} : memref<1x1xf32, #tpu.memory_space<vmem>>, vector<1x1xf32>,
    return
  }
  func.func @transform_0(%arg0: i32) -> (i32, i32) {
    %c0_i32 = arith.constant 0 : i32
    %c0_i32_0 = arith.constant 0 : i32
    return %c0_i32, %arg0 : i32, i32
  }
  func.func @transform_1(%arg0: i32) -> (i32, i32) {
    %c0_i32 = arith.constant 0 : i32
    %c0_i32_0 = arith.constant 0 : i32
    return %c0_i32, %arg0 : i32, i32
  }
  func.func @transform_2(%arg0: i32) -> (i32, i32) {
    %c0_i32 = arith.constant 0 : i32
    %c0_i32_0 = arith.constant 0 : i32
    %c0_i32_1 = arith.constant 0 : i32
    return %c0_i32, %c0_i32_0 : i32, i32
  }
}

</mosaic_0001>

<bundles_post_ra>
// kernel: tpu_custom_call.1
= control target key start
LH: loop header
LB: loop body
LE: loop exit
PB: predicated region body
PF: predicated region fallthrough
CT: control target
= control target key end

     0   :  { %7 = vsyncpa [#allocation3], 0  ;;  %s224_s0 = inlined_call_operand.hbm [shape: f32[7,128], index: 0, kind: input, shape index: {}]   ;;  %s225_s1 = inlined_call_operand.hbm [shape: f32[7,128], index: 1, kind: input, shape index: {}]   ;;  %s226_s2 = inlined_call_operand.hbm [shape: f32[1,1], index: 2, kind: output, shape index: {}]  }
   0x1   :  { %8 = vsyncpa [#allocation6], 0 }
   0x2   :  { %9 = vsyncpa [#allocation4], 0  ;;  %s166_s9 = smov [#allocation2]   ;;  %s167_s11 = smov [#allocation5]  }
   0x3   :  { %s16_s10 = sshll.u32 %s166_s9, 4  ;;  %s26_s12 = sshll.u32 %s167_s11, 4  ;;  %s17_s10 = int_to_ptr.vmem [resolvable:$true] %s16_s10  ;;  %s27_s12 = int_to_ptr.vmem [resolvable:$true] %s26_s12 }
   0x4   :  { %s94_s15 = scalar_lea.hbm %s224_s0, 128 }
   0x5   :  { %p95_p0 = scmp.ne.s32.totalorder %s224_s0, %s94_s15  ;;  %p98_p1 = scmp.lt.u32.totalorder %s94_s15, %s224_s0 }
   0x7   :  { %p100_p2 = pnand %p98_p1, %p95_p0 }
   0x9   :  { %103 = shalt.err (!%p100_p2)
}
   0xa   :  { %s104_s20 = scalar_lea.vmem %s17_s10, 128  ;;  %p109_p4 = scmp.lt.s32.totalorder %s17_s10, %s17_s10 }
   0xb   :  { %p105_p3 = scmp.ne.s32.totalorder %s17_s10, %s104_s20  ;;  %p110_p5 = scmp.lt.s32.totalorder %s104_s20, %s104_s20 }
   0xd   :  { %p111_p6 = por %p110_p5, %p109_p4 }
   0xf   :  { %p112_p7 = pnand %p111_p6, %p105_p3 }
  0x11   :  { %115 = shalt.err (!%p112_p7)
}
  0x12   :  { %19 = dma.hbm_to_vmem [thread:$0]  %s224_s0, 128, %s17_s10, [#allocation3]  }
  0x13   :  { %s116_s25 = scalar_lea.hbm %s225_s1, 128 }
  0x14   :  { %p117_p8 = scmp.ne.s32.totalorder %s225_s1, %s116_s25  ;;  %p120_p9 = scmp.lt.u32.totalorder %s116_s25, %s225_s1 }
  0x16   :  { %p122_p10 = pnand %p120_p9, %p117_p8 }
  0x18   :  { %125 = shalt.err (!%p122_p10)
}
  0x19   :  { %s126_s30 = scalar_lea.vmem %s27_s12, 128  ;;  %p131_p12 = scmp.lt.s32.totalorder %s27_s12, %s27_s12 }
  0x1a   :  { %p127_p11 = scmp.ne.s32.totalorder %s27_s12, %s126_s30  ;;  %p132_p13 = scmp.lt.s32.totalorder %s126_s30, %s126_s30 }
  0x1c   :  { %p133_p0 = por %p132_p13, %p131_p12 }
  0x1e   :  { %p134_p1 = pnand %p133_p0, %p127_p11 }
  0x20   :  { %137 = shalt.err (!%p134_p1)
}
  0x21   :  { %29 = dma.hbm_to_vmem [thread:$0]  %s225_s1, 128, %s27_s12, [#allocation6]  }
  0x22   :  { %160 = dma.done.wait [#allocation3], 128  }
  0x23   :  { %161 = vsyncadd [#allocation3], 4294967168 }
  0x24   :  { %162 = dma.done.wait [#allocation6], 128  }
  0x25   :  { %163 = vsyncadd [#allocation6], 4294967168  ;;  %vm40_vm0 = vcmask 0   ;;  %v168_v0 = vmov 0.0   ;;  %v42_v1 = vld [vmem:[#allocation2] sm:$0x7f]  ;;  %v50_v6 = vlaneseq }
  0x26   :  { %41 = vst.msk [vmem:[#allocation7] sm:$0x1] %vm40_vm0, %v168_v0  ;;  %v43_v2 = vld [vmem:[#allocation5] sm:$0x7f]  ;;  %vm46_vm1 = vcmask 1046528   ;;  %v169_v8 = vmov 1.25  }
  0x27   :  { %v44_v3 = vsub.f32 %v42_v1, %v43_v2  ;;  %v51_v7 = vshrl.u32 %v50_v6, 7  ;;  %vm55_vm3 = vcmask 6144   ;;  %s170_s1 = smov [#allocation7]  }
  0x28   :  { %s77_s4 = sshll.u32 %s170_s1, 4  ;;  %s78_s4 = int_to_ptr.vmem [resolvable:$true] %s77_s4 }
  0x29   :  { %v45_v4 = vmul.f32 %v44_v3, %v44_v3  ;;  %vm52_vm2 = vcmp.lt.s32.totalorder %v51_v7, 3  ;;  %s138_s6 = scalar_lea.vmem %s78_s4, 16  ;;  %s142_s7 = scalar_lea.vmem %s78_s4, 32 }
  0x2a   :  { %v53_v9 = vsel %vm52_vm2, 0.083333336, %v169_v8  ;;  %p139_p2 = scmp.ne.s32.totalorder %s78_s4, %s138_s6  ;;  %p143_p3 = scmp.lt.s32.totalorder %s78_s4, %s78_s4 }
  0x2b   :  { %v47_v5 = vsel %vm46_vm1, %v45_v4, 0.0  ;;  %p144_p4 = scmp.lt.s32.totalorder %s142_s7, %s138_s6 }
  0x2c   :  { %48 = vadd.xlane.f32.xlu0 %v47_v5 }
  0x2d   :  { %v66_v20 = vld [vmem:[#allocation7] sm:$0x1]  ;;  %p145_p5 = por %p144_p4, %p143_p3 }
  0x2f   :  { %p146_p6 = pnand %p145_p5, %p139_p2 }
  0xb9   :  { %v49_v10 = vpop.xlane.xlu0 %48 }
  0xba   :  { %v54_v11 = vmul.f32 %v53_v9, %v49_v10 }
  0xbc   :  { %v56_v12 = vsel %vm55_vm3, %v54_v11, 0.0 }
  0xbd   :  { %57 = vadd.xlane.f32.xlu0 %v56_v12 }
 0x14a   :  { %v58_v13 = vpop.xlane.xlu0 %57 }
 0x14b   :  { %v59_v14 = vrot.slane %v58_v13, 4 }
 0x14d   :  { %v60_v15 = vadd.f32 %v59_v14, %v58_v13 }
 0x14f   :  { %v61_v16 = vrot.slane %v60_v15, 2 }
 0x151   :  { %v62_v17 = vadd.f32 %v61_v16, %v60_v15 }
 0x153   :  { %v63_v18 = vrot.slane %v62_v17, 1 }
 0x155   :  { %v64_v19 = vadd.f32 %v63_v18, %v62_v17 }
 0x157   :  { %87 = vpush %v64_v19 }
 0x188   :  { %s88_s5 = spop %87 }
 0x189   :  { %v67_v21 = vstv %s88_s5 }
 0x18a   :  { %v68_v22 = vadd.f32 %v67_v21, %v66_v20 }
 0x18c   :  { %70 = vst.msk [vmem:[#allocation7] sm:$0x1] %vm40_vm0, %v68_v22 }
 0x18d   :  { %149 = shalt.err (!%p146_p6)
}
 0x18e   :  { %s150_s10 = scalar_lea.hbm %s226_s2, 16 }
 0x18f   :  { %p151_p7 = scmp.ne.s32.totalorder %s226_s2, %s150_s10  ;;  %p154_p8 = scmp.lt.u32.totalorder %s150_s10, %s226_s2 }
 0x191   :  { %p156_p9 = pnand %p154_p8, %p151_p7 }
 0x193   :  { %159 = shalt.err (!%p156_p9)
}
 0x194   :  { %80 = dma.vmem_to_hbm [thread:$0]  %s78_s4, 16, %s226_s2, [#allocation4]  }
 0x195   :  { %164 = dma.done.wait [#allocation4], 16  }
 0x196   :  { %165 = vsyncadd [#allocation4], 4294967280 }
 0x197   :  { %84 = vsyncpa [#allocation3], 1 }
 0x198   :  { %85 = vsyncpa [#allocation6], 1 }
 0x199   :  { %86 = vsyncpa [#allocation4], 1 }

</bundles_post_ra>
